<compile_context>
chip_gen: v7x
topology: tpu7x:2x2x1
jax: 0.10.0
libtpu: 0.0.40
codegen_flags: <defaults>
</compile_context>

<pallas_src>
import functools
import math

import jax
import jax.numpy as jnp
import numpy as np
from jax import lax
from jax.experimental import pallas as pl
from jax.experimental.pallas import tpu as pltpu


# ---------------------------------------------------------------------------
# Pass 1: squared-Euclidean cost matrix on the MXU, gridded over the batch.
# ---------------------------------------------------------------------------
def cost_matrix_kernel(x_ref, y_ref, c_ref, cmax_ref):
    x = x_ref[...]                                           # (1, P1, D)
    y = y_ref[...]                                           # (1, P2, D)
    xx = jnp.sum(x * x, axis=-1, keepdims=True)              # (1, P1, 1)
    yy = jnp.sum(y * y, axis=-1)[:, None, :]                 # (1, 1, P2)
    xy = jnp.einsum('bid,bjd->bij', x, y,
                    preferred_element_type=jnp.float32)      # (1, P1, P2), MXU
    C = xx + yy - 2.0 * xy                                   # |x_i - y_j|^2
    c_ref[...] = C
    cmax_ref[...] = jnp.max(C, axis=(1, 2), keepdims=True)   # per-batch max


# ---------------------------------------------------------------------------
# Pass 2: log-domain Sinkhorn iterations over the whole batch.
# ---------------------------------------------------------------------------
def sinkhorn_loop_kernel(scal_ref, c_raw_ref, cost_ref, pi_ref, c_ref, *,
                         max_iter, thresh, check_every):
    eps = scal_ref[0]                       # (possibly learnable) eps parameter
    cmax = scal_ref[1]                      # global max(C) from pass 1
    inv_eps = 1.0 / eps                     # hoisted out of the loop (scalar)

    C = c_raw_ref[...] / cmax               # global normalization (done once)
    N, P1, P2 = C.shape

    # mu/nu are uniform, so eps*log(mu+1e-8) collapses to compile-time scalars.
    eps_log_mu = eps * math.log(1.0 / P1 + 1e-8)
    eps_log_nu = eps * math.log(1.0 / P2 + 1e-8)

    def M(u, v):
        # M_ij = (-C_ij + u_i + v_j) / eps, as a multiply by the hoisted 1/eps.
        return (u[:, :, None] + v[:, None, :] - C) * inv_eps

    def lse(m, axis):
        # Stable logsumexp over `axis`; axis=-2 avoids the per-iteration
        # full-tensor transpose the reference (and torch) code performs.
        mx = jnp.max(m, axis=axis, keepdims=True)
        return jnp.squeeze(mx, axis) + jnp.log(jnp.sum(jnp.exp(m - mx), axis=axis))

    def one_iter(u, v):
        u = eps_log_mu - eps * lse(M(u, v), -1) + u
        v = eps_log_nu - eps * lse(M(u, v), -2) + v
        return u, v

    def cond(carry):
        it, _, _, err = carry
        return jnp.logical_and(it < max_iter, err >= thresh)

    def body(carry):
        it, u, v, _ = carry

        def inner(_, uvp):
            u, v, _ = uvp
            u_prev = u
            u, v = one_iter(u, v)
            return u, v, u_prev

        # `check_every` Sinkhorn updates per convergence test (unrolled so the
        # scalar err check does not serialize every iteration).  The error is
        # the same single-step metric PyTorch uses, evaluated at the last
        # update of the block.
        u, v, u_prev = lax.fori_loop(0, check_every, inner, (u, v, u),
                                     unroll=True)
        err = jnp.mean(jnp.sum(jnp.abs(u - u_prev), axis=-1))
        return it + check_every, u, v, err

    u0 = jnp.zeros((N, P1), jnp.float32)
    v0 = jnp.zeros((N, P2), jnp.float32)
    _, u, v, _ = lax.while_loop(
        cond, body, (jnp.int32(0), u0, v0, jnp.float32(jnp.inf)))

    pi = jnp.exp(M(u, v))                                    # transport plan
    cost_ref[...] = jnp.sum(pi * C, axis=(-2, -1))[:, None]  # (N, 1)
    pi_ref[...] = pi
    c_ref[...] = C


def sinkhorn(x, y, eps=0.1, max_iter=50, thresh=1e-3, reduction='none',
             check_every=5):
    x = jnp.asarray(x, jnp.float32)
    y = jnp.asarray(y, jnp.float32)
    N, P1, D = x.shape
    P2 = y.shape[1]

    # Keep the max_iter bound exact: use a check interval dividing max_iter so
    # the non-converged path runs exactly max_iter iterations (like PyTorch).
    ce = max(1, min(int(check_every), int(max_iter)))
    while max_iter % ce:
        ce -= 1

    # ---- Pass 1: cost matrix + per-batch max, parallel over the batch. ----
    c_raw, cmax_b = pl.pallas_call(
        cost_matrix_kernel,
        grid=(N,),
        out_shape=(jax.ShapeDtypeStruct((N, P1, P2), jnp.float32),
                   jax.ShapeDtypeStruct((N, 1, 1), jnp.float32)),
        in_specs=[pl.BlockSpec((1, P1, D), lambda n: (n, 0, 0)),
                  pl.BlockSpec((1, P2, D), lambda n: (n, 0, 0))],
        out_specs=(pl.BlockSpec((1, P1, P2), lambda n: (n, 0, 0)),
                   pl.BlockSpec((1, 1, 1), lambda n: (n, 0, 0))),
        compiler_params=pltpu.CompilerParams(
            dimension_semantics=("parallel",)),
    )(x, y)

    # Global (cross-batch) normalization scalar == C.max() in the PyTorch code.
    cmax = jnp.max(cmax_b)

    # eps behaves like nn.Parameter(eps): pass it as a runtime scalar in SMEM.
    scalars = jnp.stack([jnp.asarray(eps, dtype=jnp.float32),
                         cmax.astype(jnp.float32)])

    # Scoped-VMEM budget: ~C + pi + C_out + a few logsumexp temporaries.
    vmem_limit = int(min(110 * 2**20, max(16 * 2**20, 16 * N * P1 * P2 * 4)))

    kernel = functools.partial(sinkhorn_loop_kernel, max_iter=int(max_iter),
                               thresh=float(thresh), check_every=ce)
    cost2d, pi, C = pl.pallas_call(
        kernel,
        out_shape=(jax.ShapeDtypeStruct((N, 1), jnp.float32),
                   jax.ShapeDtypeStruct((N, P1, P2), jnp.float32),
                   jax.ShapeDtypeStruct((N, P1, P2), jnp.float32)),
        in_specs=[pl.BlockSpec(memory_space=pltpu.MemorySpace.SMEM),   # [eps, cmax]
                  pl.BlockSpec(memory_space=pltpu.MemorySpace.VMEM)],  # raw C
        out_specs=(pl.BlockSpec(memory_space=pltpu.MemorySpace.VMEM),
                   pl.BlockSpec(memory_space=pltpu.MemorySpace.VMEM),
                   pl.BlockSpec(memory_space=pltpu.MemorySpace.VMEM)),
        compiler_params=pltpu.CompilerParams(vmem_limit_bytes=vmem_limit),
    )(scalars, c_raw)

    cost = cost2d[:, 0]
    if reduction == 'mean':
        cost = jnp.mean(cost)
    elif reduction == 'sum':
        cost = jnp.sum(cost)
    return cost, pi, C


def sinkhorn_ref(x, y, eps, max_iter, thresh):
    """Pure-JAX reference mirroring the PyTorch forward (host-side early break)."""
    diff = x[:, :, None, :] - y[:, None, :, :]
    C = jnp.sum(jnp.abs(diff) ** 2, -1)
    C = C / jnp.max(C)
    N, P1, P2 = C.shape
    mu = jnp.full((N, P1), 1.0 / P1, jnp.float32)
    nu = jnp.full((N, P2), 1.0 / P2, jnp.float32)
    u = jnp.zeros_like(mu)
    v = jnp.zeros_like(nu)

    def M(u, v):
        return (-C + u[:, :, None] + v[:, None, :]) / eps

    for _ in range(max_iter):
        u1 = u
        u = eps * (jnp.log(mu + 1e-8)
                   - jax.scipy.special.logsumexp(M(u, v), axis=-1)) + u
        v = eps * (jnp.log(nu + 1e-8)
                   - jax.scipy.special.logsumexp(jnp.swapaxes(M(u, v), -2, -1),
                                                 axis=-1)) + v
        err = float(jnp.mean(jnp.sum(jnp.abs(u - u1), -1)))
        if err < thresh:
            break
    pi = jnp.exp(M(u, v))
    cost = jnp.sum(pi * C, axis=(-2, -1))
    return cost, pi, C


if __name__ == "__main__":
    key = jax.random.PRNGKey(0)
    kx, ky = jax.random.split(key)
    N, P1, P2, D = 2, 8, 16, 4
    x = jax.random.normal(kx, (N, P1, D), dtype=jnp.float32)
    y = jax.random.normal(ky, (N, P2, D), dtype=jnp.float32)

    eps, max_iter, thresh = 0.1, 50, 1e-3

    cost, pi, C = sinkhorn(x, y, eps=eps, max_iter=max_iter, thresh=thresh)
    jax.block_until_ready((cost, pi, C))

    cost_r, pi_r, C_r = sinkhorn_ref(x, y, eps, max_iter, thresh)
    np.testing.assert_allclose(np.asarray(C), np.asarray(C_r),
                               rtol=1e-4, atol=1e-5)
    # The kernel tests convergence every `check_every` iterations, so when the
    # reference breaks early the kernel may run up to check_every-1 extra
    # refinement iterations past the break point; tolerances account for that.
    np.testing.assert_allclose(np.asarray(pi), np.asarray(pi_r),
                               rtol=3e-2, atol=1e-4)
    np.testing.assert_allclose(np.asarray(cost), np.asarray(cost_r),
                               rtol=3e-2, atol=1e-4)

    print("KERNEL_OK")
</pallas_src>

<mosaic_0001>
module attributes {stable_mosaic.version = 11 : i64} {
  func.func @cost_matrix_kernel(%arg0: i32, %arg1: memref<1x8x4xf32, #tpu.memory_space<vmem>>, %arg2: memref<1x16x4xf32, #tpu.memory_space<vmem>>, %arg3: memref<1x8x16xf32, #tpu.memory_space<vmem>>, %arg4: memref<1x1x1xf32, #tpu.memory_space<vmem>>) attributes {dimension_semantics = [#tpu.dimension_semantics<parallel>], iteration_bounds = array<i64: 2>, scalar_prefetch = 0 : i64, scratch_operands = 0 : i64, tpu.core_type = #tpu.core_type<tc>, window_params = [{transform_indices = @transform_0, window_bounds = array<i64: 1, 8, 4>}, {transform_indices = @transform_1, window_bounds = array<i64: 1, 16, 4>}, {transform_indices = @transform_2, window_bounds = array<i64: 1, 8, 16>}, {transform_indices = @transform_3, window_bounds = array<i64: 1, 1, 1>}]} {
    %c0 = arith.constant 0 : index
    %c0_0 = arith.constant 0 : index
    %c0_1 = arith.constant 0 : index
    %0 = vector.load %arg1[%c0, %c0_0, %c0_1] : memref<1x8x4xf32, #tpu.memory_space<vmem>>, vector<1x8x4xf32>
    %c0_2 = arith.constant 0 : index
    %c0_3 = arith.constant 0 : index
    %c0_4 = arith.constant 0 : index
    %1 = vector.load %arg2[%c0_2, %c0_3, %c0_4] : memref<1x16x4xf32, #tpu.memory_space<vmem>>, vector<1x16x4xf32>
    %2 = arith.mulf %0, %0 : vector<1x8x4xf32>
    %cst = arith.constant dense<0.000000e+00> : vector<1x8xf32>
    %3 = vector.multi_reduction <add>, %2, %cst [2] : vector<1x8x4xf32> to vector<1x8xf32>
    %4 = vector.shape_cast %3 : vector<1x8xf32> to vector<1x8x1xf32>
    %5 = arith.mulf %1, %1 : vector<1x16x4xf32>
    %cst_5 = arith.constant dense<0.000000e+00> : vector<1x16xf32>
    %6 = vector.multi_reduction <add>, %5, %cst_5 [2] : vector<1x16x4xf32> to vector<1x16xf32>
    %7 = vector.shape_cast %6 : vector<1x16xf32> to vector<1x1x16xf32>
    "tpu.trace_start"() <{level = 10 : i32, message = "bid,bjd->bij"}> : () -> ()
    %cst_6 = arith.constant dense<0.000000e+00> : vector<1x8x16xf32>
    %8 = tpu.matmul %0, %1, %cst_6 {dimension_numbers = #tpu.dot_dimension_numbers<[2], [2], [1], [1], [0, 0, 0, 1, 1, 1], [0], [0]>} : vector<1x8x4xf32>, vector<1x16x4xf32>, vector<1x8x16xf32> -> vector<1x8x16xf32>
    "tpu.trace_stop"() : () -> ()
    %9 = vector.broadcast %4 : vector<1x8x1xf32> to vector<1x8x16xf32>
    %10 = vector.broadcast %7 : vector<1x1x16xf32> to vector<1x8x16xf32>
    %11 = arith.addf %9, %10 : vector<1x8x16xf32>
    %cst_7 = arith.constant 2.000000e+00 : f32
    %12 = vector.broadcast %cst_7 : f32 to vector<1x8x16xf32>
    %13 = arith.mulf %12, %8 : vector<1x8x16xf32>
    %14 = arith.subf %11, %13 : vector<1x8x16xf32>
    %c0_8 = arith.constant 0 : index
    %c0_9 = arith.constant 0 : index
    %c0_10 = arith.constant 0 : index
    %15 = vector.load %arg3[%c0_8, %c0_9, %c0_10] : memref<1x8x16xf32, #tpu.memory_space<vmem>>, vector<1x8x16xf32>
    tpu.vector_store %arg3[%c0_8, %c0_9, %c0_10], %14 {strides = array<i32>} : memref<1x8x16xf32, #tpu.memory_space<vmem>>, vector<1x8x16xf32>,
    %cst_11 = arith.constant dense<0xFF800000> : vector<1xf32>
    %16 = vector.multi_reduction <maximumf>, %14, %cst_11 [1, 2] : vector<1x8x16xf32> to vector<1xf32>
    %17 = vector.shape_cast %16 : vector<1xf32> to vector<1x1x1xf32>
    %c0_12 = arith.constant 0 : index
    %c0_13 = arith.constant 0 : index
    %c0_14 = arith.constant 0 : index
    %18 = vector.load %arg4[%c0_12, %c0_13, %c0_14] : memref<1x1x1xf32, #tpu.memory_space<vmem>>, vector<1x1x1xf32>
    tpu.vector_store %arg4[%c0_12, %c0_13, %c0_14], %17 {strides = array<i32>} : memref<1x1x1xf32, #tpu.memory_space<vmem>>, vector<1x1x1xf32>,
    return
  }
  func.func @transform_0(%arg0: i32) -> (i32, i32, i32) {
    %c0_i32 = arith.constant 0 : i32
    %c0_i32_0 = arith.constant 0 : i32
    %c0_i32_1 = arith.constant 0 : i32
    return %arg0, %c0_i32, %c0_i32_0 : i32, i32, i32
  }
  func.func @transform_1(%arg0: i32) -> (i32, i32, i32) {
    %c0_i32 = arith.constant 0 : i32
    %c0_i32_0 = arith.constant 0 : i32
    %c0_i32_1 = arith.constant 0 : i32
    return %arg0, %c0_i32, %c0_i32_0 : i32, i32, i32
  }
  func.func @transform_2(%arg0: i32) -> (i32, i32, i32) {
    %c0_i32 = arith.constant 0 : i32
    %c0_i32_0 = arith.constant 0 : i32
    %c0_i32_1 = arith.constant 0 : i32
    return %arg0, %c0_i32, %c0_i32_0 : i32, i32, i32
  }
  func.func @transform_3(%arg0: i32) -> (i32, i32, i32) {
    %c0_i32 = arith.constant 0 : i32
    %c0_i32_0 = arith.constant 0 : i32
    %c0_i32_1 = arith.constant 0 : i32
    return %arg0, %c0_i32, %c0_i32_0 : i32, i32, i32
  }
}

</mosaic_0001>

<bundles_post_ra>
// kernel: tpu_custom_call.1
= control target key start
LH: loop header
LB: loop body
LE: loop exit
PB: predicated region body
PF: predicated region fallthrough
CT: control target
= control target key end

     0   :  { %9 = vsyncpa [#allocation3], 0  ;;  %s715_s0 = inlined_call_operand.vmem [shape: f32[2,8,4], index: 0, kind: input, shape index: {}]   ;;  %s716_s1 = inlined_call_operand.vmem [shape: f32[2,16,4], index: 1, kind: input, shape index: {}]   ;;  %s717_s2 = inlined_call_operand.hbm [shape: f32[2,8,16], index: 2, kind: output, shape index: {0}]   ;;  %s718_s3 = inlined_call_operand.vmem [shape: f32[2,1,1], index: 3, kind: output, shape index: {1}]  }
   0x1   :  { %11 = vsyncpa [#allocation3 + $0x1], 0  ;;  %s604_s12 = smov 0   ;;  %s606_s13 = smov 0  }
   0x2   :  { %s608_s14 = smov 0   ;;  %s610_s15 = smov 0  }
   0x3 LB: > { %s625_s16 = sadd.s32 4294967295, %s578_s15   ;;  %s444_s17 = sadd.s32 4294967294, %s578_s15   ;;  %s578_s15 = sphi %s610_s15, %s724_s15   ;;  %s574_s14 = sphi %s608_s14, %s723_s14   ;;  %s570_s13 = sphi %s606_s13, %s722_s13   ;;  %s566_s12 = sphi %s604_s12, %s721_s12  }
   0x4   : > { %s629_s18 = sadd.s32 1, %s578_s15   ;;  %s76_s19 = sadd.s32 1, %s574_s14 }
   0x5   : > { %s73_s20 = ssub.s32 %s578_s15, %s629_s18  ;;  %p86_p0 = scmp.ne.s32.totalorder %s574_s14, %s570_s13 }
   0x6   : > { %p74_p1 = scmp.eq.s32.totalorder %s73_s20, 0  ;;  %p87_p2 = scmp.eq.s32.totalorder %s625_s16, 1 }
   0x7   : > { %p92_p3 = scmp.ne.s32.totalorder %s570_s13, %s566_s12  ;;  %p93_p4 = scmp.eq.s32.totalorder %s444_s17, 1 }
   0x8   : > { %s640_s21 = scalar_select %p74_p1, %s574_s14, %s76_s19  }
   0x9   : > { %p642_p5 = por %p87_p2, %p86_p0  ;;  %p646_p6 = por %p93_p4, %p92_p3 }
   0xa   : > { %p447_p7 = scmp.ge.s32.totalorder %s578_s15, 1  ;;  %p152_p8 = scmp.lt.s32.totalorder %s578_s15, 3 }
   0xc   : > { %p153_p9 = pnand %p447_p7, %p152_p8 }
   0xd   : > { %p183_p10 = scmp.lt.s32.totalorder (!%p153_p9), %s625_s16, 1  ;;  %v580_v0 = vmov (!%p153_p9), 0.0|0.0   ;;  %vm581_vm0 = vmmov (!%p153_p9), 0   ;;  %v582_v1 = vmov (!%p153_p9), 0.0   ;;  %vm199_vm1 = vcmask (!%p153_p9), 31744   ;;  %s175_s6 = sand.u32 (!%p153_p9), 1, %s570_s13  }
   0xe   : > { %156 = sbr.rel (%p153_p9) target bundleno = 407 (0x197), region = 28  ;;  %470 = vmatprep.subr.bf16.mxu0 (!%p153_p9), %v580_v0  ;;  %467 = vmatprep.mubr.msk.f32.mxu0 (!%p153_p9), %vm581_vm0, %v582_v1  ;;  %vm472_vm2 = vmpackc.low (!%p153_p9), %vm199_vm1, %vm199_vm1  ;;  %v292_v12 = vlaneseq (!%p153_p9)  ;;  %vm303_vm3 = vcmask (!%p153_p9), 130112   ;;  %s448_s7 = sshll.u32 (!%p153_p9), %s175_s6, 3  ;;  %vm321_vm4 = vcmask (!%p153_p9), 130048  }
   0xf   : > { %s177_s8 = scalar_lea.vmem (!%p153_p9), [#allocation2], %s448_s7  ;;  %s456_s9 = sshll.u32 (!%p153_p9), %s625_s16, 7 }
  0x10   : > { %v293_v13 = vand.u32 (!%p153_p9), 127, %v292_v12  ;;  %v295_v15 = vshrl.u32 (!%p153_p9), %v292_v12, 7  ;;  %s351_s10 = sshll.u32 (!%p153_p9), %s177_s8, 4  ;;  %s675_s19 = scalar_lea.hbm (!%p153_p9), %s717_s2, %s456_s9  ;;  %s352_s10 = int_to_ptr.vmem [resolvable:$true] %s351_s10 }
  0x11   : > { %s335_s20 = scalar_lea.sflag (!%p153_p9), [#allocation3], %s175_s6 }
  0x12   : > { %v298_v16 = vadd.s32 (!%p153_p9), 4294967288, %v293_v13  ;;  %v296_v17 = vsub.s32 (!%p153_p9), %v293_v13, %v295_v15 }
  0x14   : > { %v301_v18 = vsub.s32 (!%p153_p9), %v298_v16, %v295_v15 }
  0x15   : > { %s654_s24 = scalar_select %p183_p10, %s625_s16, 1 }
  0x17   : > { %s459_s25 = sshll.u32 %s654_s24, 4  ;;  %s449_s26 = sshll.u32 %s654_s24, 3 }
  0x18   : > { %s191_s29 = scalar_lea.vmem %s716_s1, %s459_s25  ;;  %s186_s5 = scalar_lea.vmem %s715_s0, %s449_s26 }
  0x19   : > { %v196_v2 = vld [vmem:[%s191_s29] sm:$0xff]  ;;  %v197_v3 = vld [vmem:[%s191_s29 + $0x8] sm:$0xff]  ;;  %s516_s25 = scalar_lea.vmem %s352_s10, 128  ;;  %s583_s26 = smov [#allocation2]  }
  0x1a   : > { %v195_v4 = vld [vmem:[%s186_s5] sm:$0xff]  ;;  %v471_v5 = vpack.c.bf16 %v197_v3, %v196_v2  ;;  %v203_v6 = vmul.f32 %v196_v2, %v196_v2  ;;  %v204_v7 = vmul.f32 %v197_v3, %v197_v3  ;;  %p517_p11 = scmp.ne.s32.totalorder %s352_s10, %s516_s25  ;;  %s520_s27 = sshll.u32 %s583_s26, 4  ;;  %s521_s27 = int_to_ptr.vmem [resolvable:$false] %s520_s27 }
  0x1b   : > { %v198_v8 = vmul.f32 %v195_v4, %v195_v4  ;;  %s522_s28 = scalar_lea.vmem %s521_s27, 256  ;;  %p523_p0 = scmp.lt.s32.totalorder %s352_s10, %s521_s27 }
  0x1c   : > { %473 = vmatpush3.bf16.xpose.msk.msra.mxu0 %vm472_vm2, %v471_v5  ;;  %v205_v9 = vsel %vm199_vm1, %v203_v6, 0.0  ;;  %v208_v11 = vsel %vm199_vm1, %v204_v7, 0.0  ;;  %p518_p12 = pnand %p517_p11, %p642_p5  ;;  %p524_p1 = scmp.lt.s32.totalorder %s522_s28, %s516_s25 }
  0x1d   : > { %v200_v10 = vsel %vm199_vm1, %v198_v8, 0.0  ;;  %206 = vadd.xlane.f32.xlu0 %v205_v9 }
  0x1e   : > { %201 = vadd.xlane.f32.xlu1 %v200_v10  ;;  %p519_p13 = pneg %p518_p12  ;;  %p525_p2 = por %p524_p1, %p523_p0 }
  0x20   : > { %p526_p3 = pnand %p525_p2, %p519_p13 }
  0x21   : > { %209 = vadd.xlane.f32.xlu0 %v208_v11 }
  0x23   : > { %468 = vmatmul.mubr.msk.f32.vlgmr.msra.gmra.mrb[0].mxu0 %vm199_vm1, %v195_v4 }
  0xaa   : > { %v207_v14 = vpop.xlane.xlu0 %206 }
  0xab   : > { %v297_v20 = vrot.slane %v207_v14, %v296_v17  ;;  %v202_v23 = vpop.xlane.xlu1 %201 }
  0xae   : > { %v210_v19 = vpop.xlane.xlu0 %209 }
  0xaf   : > { %v302_v21 = vrot.slane %v210_v19, %v301_v18 }
  0xb1   : > { %v304_v22 = vsel %vm303_vm3, %v302_v21, %v297_v20 }
  0xb2   : > { %v318_v25 = vadd.f32 %v304_v22, %v202_v23 }
  0xf6   : > { %v286_v24 = vpop.f32.mrb[0].mxu0 }
  0xf7   : > { %v319_v26 = vmul.f32 2.0, %v286_v24  ;;  %v469_v27 = vpop.f32.mrb[1].mxu0 }
  0xf9   : > { %v320_v28 = vsub.f32 %v318_v25, %v319_v26 }
  0xfb   : > { %v323_v29 = vsel %vm321_vm4, %v320_v28, -inf  ;;  %322 = vst.msk [vmem:[%s177_s8] sm:$0xff] %vm321_vm4, %v320_v28 }
  0xfc   : > { %324 = vmax.xlane.f32.xlu1 %v323_v29 }
  0xfd   : > { %529 = shalt.err (!%p526_p3)
}
  0xfe   : > { %s530_s16 = scalar_lea.hbm %s675_s19, 128  ;;  %s534_s4 = scalar_lea.hbm %s717_s2, 256 }
  0xff   : > { %p531_p4 = scmp.ne.s32.totalorder %s675_s19, %s530_s16  ;;  %p535_p9 = scmp.lt.u32.totalorder %s675_s19, %s717_s2 }
 0x100   : > { %p536_p10 = scmp.lt.u32.totalorder %s534_s4, %s530_s16  ;;  %p538_p12 = scmp.lt.u32.totalorder %s530_s16, %s675_s19 }
 0x101   : > { %p532_p7 = pnand %p531_p4, %p642_p5 }
 0x102   : > { %p537_p11 = por %p536_p10, %p535_p9 }
 0x103   : > { %p533_p8 = pneg %p532_p7 }
 0x104   : > { %p539_p13 = por %p538_p12, %p537_p11 }
 0x106   : > { %p540_p0 = pnand %p539_p13, %p533_p8 }
 0x108   : > { %543 = shalt.err (!%p540_p0)
}
 0x109   : > { %474 = dma.vmem_to_hbm [thread:$0]  (%p642_p5), %s352_s10, 128, %s675_s19, %s335_s20   ;;  %vm332_vm5 = vcmask 0  }
 0x10a   : > { %s194_s9 = scalar_lea.vmem %s718_s3, %s654_s24 }
 0x189   : > { %v325_v30 = vpop.xlane.xlu1 %324 }
 0x18a   : > { %v326_v31 = vrot.slane %v325_v30, 4 }
 0x18c   : > { %v327_v32 = vmax.f32 %v325_v30, %v326_v31 }
 0x18e   : > { %v328_v33 = vrot.slane %v327_v32, 2 }
 0x190   : > { %v329_v34 = vmax.f32 %v327_v32, %v328_v33 }
 0x192   : > { %v330_v35 = vrot.slane %v329_v34, 1 }
 0x194   : > { %v331_v36 = vmax.f32 %v329_v34, %v330_v35 }
 0x196   : > { %333 = vst.msk [vmem:[%s194_s9] sm:$0x1] %vm332_vm5, %v331_v36 }
 0x197 PF: > { %p480_p1 = scmp.ge.s32.totalorder %s578_s15, 2  ;;  %s366_s22 = sand.u32 1, %s566_s12  }
 0x198   : > { %s367_s10 = scalar_lea.sflag [#allocation3], %s366_s22 }
 0x199   : > { %p477_p5 = pnand %p480_p1, %p646_p6 }
 0x19b   : > { %561 = dma.done.wait (!%p477_p5), %s367_s10, 128  }
 0x19c   : > { %563 = vsyncadd (!%p477_p5), %s367_s10, 4294967168  ;;  %p14_p2 = scmp.ge.s32.totalorder %s629_s18, 4   ;;  %s721_s12 = smov %s570_s13 }
 0x19d   : > { %s722_s13 = smov %s574_s14  ;;  %s723_s14 = smov %s640_s21 }
 0x19e   : > { %s724_s15 = smov %s629_s18  ;;  %16 = sbr.rel (!%p14_p2) target bundleno = 3 (0x3), region = 78 }
 0x1a5   :  { %378 = vsyncpa [#allocation3], 1 }
 0x1a6   :  { %380 = vsyncpa [#allocation3 + $0x1], 1 }

</bundles_post_ra>
